<compile_context>
chip_gen: v5e
topology: v5e:2x2
jax: 0.10.0
libtpu: 0.0.40
codegen_flags: <defaults>
</compile_context>

<pallas_src>
import jax
import jax.numpy as jnp
from jax.experimental import pallas as pl
from jax.experimental.pallas import tpu as pltpu


def _softplus(x):
    # log(1 + exp(x)), overflow-safe form.
    return jnp.maximum(x, 0.0) + jnp.log1p(jnp.exp(-jnp.abs(x)))


def _kl_gaussian(mu, rho):
    # KL( N(mu, sigma^2) || N(0, 1) ),  sigma = softplus(rho).
    sigma = _softplus(rho)
    var = sigma * sigma
    return 0.5 * jnp.sum(var + mu * mu - 1.0 - 2.0 * jnp.log(sigma))


def bayes_seq_kernel(x_ref, wsum_t_ref, bsum_ref,
                     wb_mu_ref, wb_rho_ref, ws_mu_ref, ws_rho_ref,
                     out_ref, kl_ref):
    # Fused forward path: one MXU push per tile, lane-dense (C, TILE_HW) output.
    acc = jnp.dot(wsum_t_ref[...], x_ref[...],
                  preferred_element_type=jnp.float32)
    out_ref[...] = (acc + bsum_ref[...]).astype(out_ref.dtype)

    # BayesSequential KL accumulation over both members (weight-only; cheap
    # EUP/XLU side work, recomputed per tile so the resident (1,1) block is
    # valid on every core under megacore sharding).
    kl = (_kl_gaussian(wb_mu_ref[...], wb_rho_ref[...]) +
          _kl_gaussian(ws_mu_ref[...], ws_rho_ref[...]))
    kl_ref[...] = jnp.reshape(kl, (1, 1))


def _pick_tile_hw(hw, cap=8192):
    # Largest multiple of 128 that divides hw, capped; else full extent.
    if hw <= 128 or hw % 128 != 0:
        return hw
    t = min(hw, cap)
    t -= t % 128
    while hw % t != 0:
        t -= 128
    return t


def bayes_sequential(x_nchw, params):
    """Returns (out[NCHW], kl) with out[n,k,:,:] = sum_c (Wb+Ws)[c,k] x[n,c,:,:] + (bb+bs)[k]."""
    wb_mu, wb_rho, bb, ws_mu, ws_rho, bs = params
    N, C, H, W = x_nchw.shape
    HW = H * W
    x = x_nchw.reshape(N, C, HW)                 # free view, NCHW-native

    # Fused forward parameters (exact algebra; KL keeps the original params).
    w_sum_t = (wb_mu + ws_mu).T                  # (C, C): out = W_sum^T @ x
    b_sum = (bb + bs).reshape(C, 1)              # broadcast over the lane axis

    tile_hw = _pick_tile_hw(HW)
    grid = (N, HW // tile_hw)

    itemsize = x.dtype.itemsize
    tile_bytes = C * tile_hw * itemsize
    param_bytes = (5 * C * C + 2 * C) * 4
    vmem_limit = int(min(64 * 1024 * 1024,
                         max(4 * 1024 * 1024, 8 * tile_bytes + 2 * param_bytes)))

    cost = pl.CostEstimate(
        flops=int(2 * N * HW * C * C),
        transcendentals=int(2 * C * C * grid[0] * grid[1]),
        bytes_accessed=int(2 * N * C * HW * itemsize + param_bytes),
    )

    const = lambda n, j: (0, 0)
    act_spec = pl.BlockSpec((None, C, tile_hw), lambda n, j: (n, 0, j))

    out, kl = pl.pallas_call(
        bayes_seq_kernel,
        out_shape=(jax.ShapeDtypeStruct((N, C, HW), x.dtype),
                   jax.ShapeDtypeStruct((1, 1), jnp.float32)),
        grid=grid,
        in_specs=[
            act_spec,                             # x tile (streamed)
            pl.BlockSpec((C, C), const),          # fused W^T      (resident)
            pl.BlockSpec((C, 1), const),          # fused bias     (resident)
            pl.BlockSpec((C, C), const),          # Wb_mu  (KL)    (resident)
            pl.BlockSpec((C, C), const),          # Wb_rho (KL)    (resident)
            pl.BlockSpec((C, C), const),          # Ws_mu  (KL)    (resident)
            pl.BlockSpec((C, C), const),          # Ws_rho (KL)    (resident)
        ],
        out_specs=(
            act_spec,                             # lane-dense output tile
            pl.BlockSpec((1, 1), const),          # scalar KL (resident block)
        ),
        compiler_params=pltpu.CompilerParams(
            dimension_semantics=("parallel", "parallel"),
            vmem_limit_bytes=vmem_limit,
        ),
        cost_estimate=cost,
    )(x, w_sum_t, b_sum, wb_mu, wb_rho, ws_mu, ws_rho)

    return out.reshape(N, C, H, W), kl[0, 0]


def _reference(x_nchw, params):
    wb_mu, wb_rho, bb, ws_mu, ws_rho, bs = params
    N, C, H, W = x_nchw.shape
    w = wb_mu + ws_mu
    b = (bb + bs).reshape(1, C, 1, 1)
    out = jnp.einsum("nchw,ck->nkhw", x_nchw, w) + b
    kl = _kl_gaussian(wb_mu, wb_rho) + _kl_gaussian(ws_mu, ws_rho)
    return out, kl


if __name__ == "__main__":
    key = jax.random.PRNGKey(0)
    N, C, H, W = 2, 32, 16, 16
    k = jax.random.split(key, 7)

    x = jax.random.normal(k[0], (N, C, H, W), dtype=jnp.float32)

    # Deterministic synthetic Bayesian parameters (posterior mean + rho).
    wb_mu = 0.1 * jax.random.normal(k[1], (C, C), dtype=jnp.float32)
    wb_rho = -3.0 + 0.05 * jax.random.normal(k[2], (C, C), dtype=jnp.float32)
    bb = 0.01 * jax.random.normal(k[3], (1, C), dtype=jnp.float32)
    ws_mu = 0.1 * jax.random.normal(k[4], (C, C), dtype=jnp.float32)
    ws_rho = -3.0 + 0.05 * jax.random.normal(k[5], (C, C), dtype=jnp.float32)
    bs = 0.01 * jax.random.normal(k[6], (1, C), dtype=jnp.float32)
    params = (wb_mu, wb_rho, bb, ws_mu, ws_rho, bs)

    out, kl_sum = bayes_sequential(x, params)
    out, kl_sum = jax.block_until_ready((out, kl_sum))

    ref_out, ref_kl = _reference(x, params)
    assert out.shape == (N, C, H, W)
    assert jnp.allclose(out, ref_out, atol=5e-4, rtol=1e-4)
    assert jnp.allclose(kl_sum, ref_kl, atol=1e-3, rtol=1e-4)

    print("KERNEL_OK")
</pallas_src>

<mosaic_0001>
module attributes {stable_mosaic.version = 11 : i64} {
  func.func @bayes_seq_kernel(%arg0: i32, %arg1: i32, %arg2: memref<1x32x256xf32, #tpu.memory_space<vmem>>, %arg3: memref<32x32xf32, #tpu.memory_space<vmem>>, %arg4: memref<32x1xf32, #tpu.memory_space<vmem>>, %arg5: memref<32x32xf32, #tpu.memory_space<vmem>>, %arg6: memref<32x32xf32, #tpu.memory_space<vmem>>, %arg7: memref<32x32xf32, #tpu.memory_space<vmem>>, %arg8: memref<32x32xf32, #tpu.memory_space<vmem>>, %arg9: memref<1x32x256xf32, #tpu.memory_space<vmem>>, %arg10: memref<1x1xf32, #tpu.memory_space<vmem>>) attributes {dimension_semantics = [#tpu.dimension_semantics<parallel>, #tpu.dimension_semantics<parallel>], iteration_bounds = array<i64: 2, 1>, scalar_prefetch = 0 : i64, scratch_operands = 0 : i64, tpu.core_type = #tpu.core_type<tc>, window_params = [{transform_indices = @transform_0, window_bounds = array<i64: 1, 32, 256>}, {pipeline_mode = #tpu.pipeline_mode<synchronous>, transform_indices = @transform_1, window_bounds = array<i64: 32, 32>}, {pipeline_mode = #tpu.pipeline_mode<synchronous>, transform_indices = @transform_2, window_bounds = array<i64: 32, 1>}, {pipeline_mode = #tpu.pipeline_mode<synchronous>, transform_indices = @transform_3, window_bounds = array<i64: 32, 32>}, {pipeline_mode = #tpu.pipeline_mode<synchronous>, transform_indices = @transform_4, window_bounds = array<i64: 32, 32>}, {pipeline_mode = #tpu.pipeline_mode<synchronous>, transform_indices = @transform_5, window_bounds = array<i64: 32, 32>}, {pipeline_mode = #tpu.pipeline_mode<synchronous>, transform_indices = @transform_6, window_bounds = array<i64: 32, 32>}, {transform_indices = @transform_7, window_bounds = array<i64: 1, 32, 256>}, {pipeline_mode = #tpu.pipeline_mode<synchronous>, transform_indices = @transform_8, window_bounds = array<i64: 1, 1>}]} {
    %c0 = arith.constant 0 : index
    %c0_0 = arith.constant 0 : index
    %0 = vector.load %arg3[%c0, %c0_0] : memref<32x32xf32, #tpu.memory_space<vmem>>, vector<32x32xf32>
    %c0_1 = arith.constant 0 : index
    %c0_2 = arith.constant 0 : index
    %c0_3 = arith.constant 0 : index
    %1 = vector.load %arg2[%c0_1, %c0_2, %c0_3] : memref<1x32x256xf32, #tpu.memory_space<vmem>>, vector<1x32x256xf32>
    %2 = vector.shape_cast %1 : vector<1x32x256xf32> to vector<32x256xf32>
    %cst = arith.constant dense<0.000000e+00> : vector<32x256xf32>
    %3 = tpu.matmul %0, %2, %cst {dimension_numbers = #tpu.dot_dimension_numbers<[1], [0], [0], [1], [0, 0, 1, 1], [], []>} : vector<32x32xf32>, vector<32x256xf32>, vector<32x256xf32> -> vector<32x256xf32>
    %c0_4 = arith.constant 0 : index
    %c0_5 = arith.constant 0 : index
    %4 = vector.load %arg4[%c0_4, %c0_5] : memref<32x1xf32, #tpu.memory_space<vmem>>, vector<32x1xf32>
    %5 = vector.broadcast %4 : vector<32x1xf32> to vector<32x256xf32>
    %6 = arith.addf %3, %5 : vector<32x256xf32>
    %c0_6 = arith.constant 0 : index
    %c0_7 = arith.constant 0 : index
    %c0_8 = arith.constant 0 : index
    %7 = vector.load %arg9[%c0_6, %c0_7, %c0_8] : memref<1x32x256xf32, #tpu.memory_space<vmem>>, vector<1x32x256xf32>
    %8 = vector.shape_cast %7 : vector<1x32x256xf32> to vector<32x256xf32>
    %9 = vector.shape_cast %6 : vector<32x256xf32> to vector<1x32x256xf32>
    tpu.vector_store %arg9[%c0_6, %c0_7, %c0_8], %9 {strides = array<i32>} : memref<1x32x256xf32, #tpu.memory_space<vmem>>, vector<1x32x256xf32>,
    %c0_9 = arith.constant 0 : index
    %c0_10 = arith.constant 0 : index
    %10 = vector.load %arg5[%c0_9, %c0_10] : memref<32x32xf32, #tpu.memory_space<vmem>>, vector<32x32xf32>
    %c0_11 = arith.constant 0 : index
    %c0_12 = arith.constant 0 : index
    %11 = vector.load %arg6[%c0_11, %c0_12] : memref<32x32xf32, #tpu.memory_space<vmem>>, vector<32x32xf32>
    %cst_13 = arith.constant 0.000000e+00 : f32
    %12 = vector.broadcast %cst_13 : f32 to vector<32x32xf32>
    %13 = arith.maximumf %11, %12 : vector<32x32xf32>
    %14 = math.absf %11 : vector<32x32xf32>
    %cst_14 = arith.constant 0.000000e+00 : f32
    %15 = vector.broadcast %cst_14 : f32 to vector<32x32xf32>
    %16 = arith.subf %15, %14 : vector<32x32xf32>
    %17 = math.exp %16 : vector<32x32xf32>
    %18 = math.log1p %17 : vector<32x32xf32>
    %19 = arith.addf %13, %18 : vector<32x32xf32>
    %20 = arith.mulf %19, %19 : vector<32x32xf32>
    %21 = arith.mulf %10, %10 : vector<32x32xf32>
    %22 = arith.addf %20, %21 : vector<32x32xf32>
    %cst_15 = arith.constant 1.000000e+00 : f32
    %23 = vector.broadcast %cst_15 : f32 to vector<32x32xf32>
    %24 = arith.subf %22, %23 : vector<32x32xf32>
    %25 = math.log %19 : vector<32x32xf32>
    %cst_16 = arith.constant 2.000000e+00 : f32
    %26 = vector.broadcast %cst_16 : f32 to vector<32x32xf32>
    %27 = arith.mulf %26, %25 : vector<32x32xf32>
    %28 = arith.subf %24, %27 : vector<32x32xf32>
    %29 = vector.shape_cast %28 : vector<32x32xf32> to vector<1x32x32xf32>
    %cst_17 = arith.constant dense<0.000000e+00> : vector<1xf32>
    %30 = vector.multi_reduction <add>, %29, %cst_17 [1, 2] : vector<1x32x32xf32> to vector<1xf32>
    %31 = vector.shape_cast %30 : vector<1xf32> to vector<1x1x1xf32>
    %32 = vector.extract %31[0, 0, 0] : f32 from vector<1x1x1xf32>
    %cst_18 = arith.constant 5.000000e-01 : f32
    %33 = arith.mulf %cst_18, %32 : f32
    %c0_19 = arith.constant 0 : index
    %c0_20 = arith.constant 0 : index
    %34 = vector.load %arg7[%c0_19, %c0_20] : memref<32x32xf32, #tpu.memory_space<vmem>>, vector<32x32xf32>
    %c0_21 = arith.constant 0 : index
    %c0_22 = arith.constant 0 : index
    %35 = vector.load %arg8[%c0_21, %c0_22] : memref<32x32xf32, #tpu.memory_space<vmem>>, vector<32x32xf32>
    %cst_23 = arith.constant 0.000000e+00 : f32
    %36 = vector.broadcast %cst_23 : f32 to vector<32x32xf32>
    %37 = arith.maximumf %35, %36 : vector<32x32xf32>
    %38 = math.absf %35 : vector<32x32xf32>
    %cst_24 = arith.constant 0.000000e+00 : f32
    %39 = vector.broadcast %cst_24 : f32 to vector<32x32xf32>
    %40 = arith.subf %39, %38 : vector<32x32xf32>
    %41 = math.exp %40 : vector<32x32xf32>
    %42 = math.log1p %41 : vector<32x32xf32>
    %43 = arith.addf %37, %42 : vector<32x32xf32>
    %44 = arith.mulf %43, %43 : vector<32x32xf32>
    %45 = arith.mulf %34, %34 : vector<32x32xf32>
    %46 = arith.addf %44, %45 : vector<32x32xf32>
    %cst_25 = arith.constant 1.000000e+00 : f32
    %47 = vector.broadcast %cst_25 : f32 to vector<32x32xf32>
    %48 = arith.subf %46, %47 : vector<32x32xf32>
    %49 = math.log %43 : vector<32x32xf32>
    %cst_26 = arith.constant 2.000000e+00 : f32
    %50 = vector.broadcast %cst_26 : f32 to vector<32x32xf32>
    %51 = arith.mulf %50, %49 : vector<32x32xf32>
    %52 = arith.subf %48, %51 : vector<32x32xf32>
    %53 = vector.shape_cast %52 : vector<32x32xf32> to vector<1x32x32xf32>
    %cst_27 = arith.constant dense<0.000000e+00> : vector<1xf32>
    %54 = vector.multi_reduction <add>, %53, %cst_27 [1, 2] : vector<1x32x32xf32> to vector<1xf32>
    %55 = vector.shape_cast %54 : vector<1xf32> to vector<1x1x1xf32>
    %56 = vector.extract %55[0, 0, 0] : f32 from vector<1x1x1xf32>
    %cst_28 = arith.constant 5.000000e-01 : f32
    %57 = arith.mulf %cst_28, %56 : f32
    %58 = arith.addf %33, %57 : f32
    %59 = vector.broadcast %58 : f32 to vector<1x1xf32>
    %c0_29 = arith.constant 0 : index
    %c0_30 = arith.constant 0 : index
    %60 = vector.load %arg10[%c0_29, %c0_30] : memref<1x1xf32, #tpu.memory_space<vmem>>, vector<1x1xf32>
    tpu.vector_store %arg10[%c0_29, %c0_30], %59 {strides = array<i32>} : memref<1x1xf32, #tpu.memory_space<vmem>>, vector<1x1xf32>,
    return
  }
  func.func @transform_0(%arg0: i32, %arg1: i32) -> (i32, i32, i32) {
    %c0_i32 = arith.constant 0 : i32
    %c0_i32_0 = arith.constant 0 : i32
    return %arg0, %c0_i32, %arg1 : i32, i32, i32
  }
  func.func @transform_1(%arg0: i32, %arg1: i32) -> (i32, i32) {
    %c0_i32 = arith.constant 0 : i32
    %c0_i32_0 = arith.constant 0 : i32
    %c0_i32_1 = arith.constant 0 : i32
    return %c0_i32, %c0_i32_0 : i32, i32
  }
  func.func @transform_2(%arg0: i32, %arg1: i32) -> (i32, i32) {
    %c0_i32 = arith.constant 0 : i32
    %c0_i32_0 = arith.constant 0 : i32
    %c0_i32_1 = arith.constant 0 : i32
    return %c0_i32, %c0_i32_0 : i32, i32
  }
  func.func @transform_3(%arg0: i32, %arg1: i32) -> (i32, i32) {
    %c0_i32 = arith.constant 0 : i32
    %c0_i32_0 = arith.constant 0 : i32
    %c0_i32_1 = arith.constant 0 : i32
    return %c0_i32, %c0_i32_0 : i32, i32
  }
  func.func @transform_4(%arg0: i32, %arg1: i32) -> (i32, i32) {
    %c0_i32 = arith.constant 0 : i32
    %c0_i32_0 = arith.constant 0 : i32
    %c0_i32_1 = arith.constant 0 : i32
    return %c0_i32, %c0_i32_0 : i32, i32
  }
  func.func @transform_5(%arg0: i32, %arg1: i32) -> (i32, i32) {
    %c0_i32 = arith.constant 0 : i32
    %c0_i32_0 = arith.constant 0 : i32
    %c0_i32_1 = arith.constant 0 : i32
    return %c0_i32, %c0_i32_0 : i32, i32
  }
  func.func @transform_6(%arg0: i32, %arg1: i32) -> (i32, i32) {
    %c0_i32 = arith.constant 0 : i32
    %c0_i32_0 = arith.constant 0 : i32
    %c0_i32_1 = arith.constant 0 : i32
    return %c0_i32, %c0_i32_0 : i32, i32
  }
  func.func @transform_7(%arg0: i32, %arg1: i32) -> (i32, i32, i32) {
    %c0_i32 = arith.constant 0 : i32
    %c0_i32_0 = arith.constant 0 : i32
    return %arg0, %c0_i32, %arg1 : i32, i32, i32
  }
  func.func @transform_8(%arg0: i32, %arg1: i32) -> (i32, i32) {
    %c0_i32 = arith.constant 0 : i32
    %c0_i32_0 = arith.constant 0 : i32
    %c0_i32_1 = arith.constant 0 : i32
    return %c0_i32, %c0_i32_0 : i32, i32
  }
}

</mosaic_0001>

<bundles_post_ra>
// kernel: tpu_custom_call.1
= control target key start
LH: loop header
LB: loop body
LE: loop exit
PB: predicated region body
PF: predicated region fallthrough
CT: control target
= control target key end

     0   :  { %s1874_s0 = inlined_call_operand.hbm [shape: f32[2,32,256], index: 0, kind: input, shape index: {}]   ;;  %s1875_s1 = inlined_call_operand.vmem [shape: f32[32,32], index: 1, kind: input, shape index: {}]   ;;  %s1876_s2 = inlined_call_operand.vmem [shape: f32[32,1], index: 2, kind: input, shape index: {}]   ;;  %s1877_s3 = inlined_call_operand.hbm [shape: f32[32,32], index: 3, kind: input, shape index: {}]   ;;  %s1878_s4 = inlined_call_operand.hbm [shape: f32[32,32], index: 4, kind: input, shape index: {}]   ;;  %s1879_s5 = inlined_call_operand.hbm [shape: f32[32,32], index: 5, kind: input, shape index: {}]   ;;  %s1880_s6 = inlined_call_operand.hbm [shape: f32[32,32], index: 6, kind: input, shape index: {}]   ;;  %s1881_s7 = inlined_call_operand.hbm [shape: f32[2,32,256], index: 7, kind: output, shape index: {0}]   ;;  %s1882_s8 = inlined_call_operand.hbm [shape: f32[1,1], index: 8, kind: output, shape index: {1}]  }
   0x1   :  { %1886 = sst [smem:[#allocation22_spill]] %s1877_s3 }
   0x2   :  { %1887 = sst [smem:[#allocation23_spill]] %s1878_s4 }
   0x3   :  { %1888 = sst [smem:[#allocation24_spill]] %s1879_s5 }
   0x4   :  { %1889 = sst [smem:[#allocation25_spill]] %s1880_s6 }
   0x5   :  { %14 = vsyncpa [#allocation3], 0 }
   0x6   :  { %16 = vsyncpa [#allocation3 + $0x1], 0 }
   0x7   :  { %17 = vsyncpa [#allocation6], 0 }
   0x8   :  { %18 = vsyncpa [#allocation9], 0 }
   0x9   :  { %19 = vsyncpa [#allocation4], 0 }
   0xa   :  { %21 = vsyncpa [#allocation4 + $0x1], 0 }
   0xb   :  { %22 = vsyncpa [#allocation13], 0  ;;  %s1485_s27 = smov 0   ;;  %s1487_s28 = smov 0  }
   0xc   :  { %s1489_s29 = smov 0   ;;  %s1491_s30 = smov 0  }
   0xd   :  { %s1493_s9 = smov 0   ;;  %s1495_s10 = smov 0  }
   0xe LB: > { %1890 = sst [smem:[#allocation19_spill]] %s1406_s27  ;;  %s931_s11 = sadd.s32 4294967295, %s1426_s10   ;;  %s1426_s10 = sphi %s1495_s10, %s28_s10   ;;  %s1422_s9 = sphi %s1493_s9, %s1928_s9   ;;  %s1418_s30 = sphi %s1491_s30, %s1927_s30   ;;  %s1414_s29 = sphi %s1489_s29, %s1926_s29   ;;  %s1410_s28 = sphi %s1487_s28, %s1925_s28   ;;  %s1406_s27 = sphi %s1485_s27, %s1924_s27  }
   0xf   : > { %s932_s12 = sadd.s32 4294967294, %s1426_s10   ;;  %p62_p0 = scmp.ne.s32.totalorder %s1410_s28, %s1406_s27 }
  0x10   : > { %p1519_p1 = scmp.eq.s32.totalorder %s931_s11, 0  ;;  %p1523_p2 = scmp.eq.s32.totalorder %s931_s11, 1 }
  0x11   : > { %p220_p3 = scmp.eq.s32.totalorder %s932_s12, 1  ;;  %p933_p5 = scmp.ge.s32.totalorder %s1426_s10, 1 }
  0x12   : > { %p1529_p4 = por %p1519_p1, %p62_p0  ;;  %p248_p7 = scmp.lt.s32.totalorder %s1426_s10, 3 }
  0x13   : > { %p1534_p6 = por %p220_p3, %p62_p0  ;;  %s1896_s3 = sld [smem:[#allocation22_spill]] }
  0x14   : > { %p1542_p8 = pnand %p933_p5, %p248_p7  ;;  %s1428_s21 = smov [#allocation5]  }
  0x15   : > { %s1894_s16 = scalar_select %p1534_p6, 1, 0 }
  0x16   : > { %p1010_p9 = pneg %p1542_p8  ;;  %s267_s22 = sshll.u32 %s1428_s21, 4  ;;  %s268_s22 = int_to_ptr.vmem [resolvable:$true] %s267_s22 }
  0x17   : > { %1895 = sst [smem:[#allocation20_spill]] %s1894_s16  ;;  %p938_p11 = scmp.ge.s32.totalorder %s1426_s10, 2 }
  0x18   : > { %p1550_p10 = pnand %p1010_p9, %p1519_p1  ;;  %s1899_s5 = sld [smem:[#allocation24_spill]] }
  0x19   : > { %s265_s19 = sshll.u32 %s1896_s3, 4  ;;  %s1429_s11 = smov 128   ;;  %s266_s19 = int_to_ptr.hbm [resolvable:$true] %s265_s19 }
  0x1a   : > { %s1430_s12 = smov 8   ;;  %s1431_s17 = smov [#allocation8]  }
  0x1b   : > { %1013 = dma.hbm_to_vmem [thread:$0]  (!%p1550_p10), %s266_s19, 512, %s268_s22, [#allocation6], %s1429_s11, %s1429_s11, %s1430_s12  }
  0x1c   : > { %s295_s18 = sshll.u32 %s1431_s17, 4  ;;  %s1900_s4 = sld [smem:[#allocation23_spill]]  ;;  %s296_s18 = int_to_ptr.vmem [resolvable:$true] %s295_s18 }
  0x1d   : > { %s1901_s6 = sld [smem:[#allocation25_spill]]  ;;  %s1432_s22 = smov [#allocation7]  }
  0x1e   : > { %s293_s26 = sshll.u32 %s1899_s5, 4  ;;  %s281_s5 = sshll.u32 %s1432_s22, 4  ;;  %s294_s26 = int_to_ptr.hbm [resolvable:$true] %s293_s26  ;;  %s282_s5 = int_to_ptr.vmem [resolvable:$true] %s281_s5 }
  0x1f   : > { %1019 = dma.hbm_to_vmem [thread:$0]  (!%p1550_p10), %s294_s26, 512, %s296_s18, [#allocation9], %s1429_s11, %s1429_s11, %s1430_s12  }
  0x20   : > { %s1433_s3 = smov [#allocation10]   ;;  %s40_s26 = sadd.s32 1, %s1422_s9 }
  0x21   : > { %s309_s17 = sshll.u32 %s1433_s3, 4  ;;  %s49_s18 = sadd.s32 1, %s1414_s29  ;;  %s310_s17 = int_to_ptr.vmem [resolvable:$true] %s309_s17 }
  0x22   : > { %s279_s16 = sshll.u32 %s1900_s4, 4  ;;  %p42_p12 = scmp.ge.s32.totalorder %s40_s26, 2  ;;  %s280_s16 = int_to_ptr.hbm [resolvable:$true] %s279_s16 }
  0x23   : > { %s307_s19 = sshll.u32 %s1901_s6, 4  ;;  %p56_p13 = scmp.ne.s32.totalorder %s1414_s29, %s1410_s28  ;;  %s308_s19 = int_to_ptr.hbm [resolvable:$true] %s307_s19 }
  0x24   : > { %1016 = dma.hbm_to_vmem [thread:$0]  (!%p1550_p10), %s280_s16, 512, %s282_s5, [#allocation6], %s1429_s11, %s1429_s11, %s1430_s12  }
  0x25   : > { %1022 = dma.hbm_to_vmem [thread:$0]  (!%p1550_p10), %s308_s19, 512, %s310_s17, [#allocation9], %s1429_s11, %s1429_s11, %s1430_s12  }
  0x26   : > { %p57_p0 = scmp.eq.s32.totalorder %s1426_s10, 0  ;;  %p1035_p3 = scmp.lt.s32.totalorder %s1426_s10, 2 }
  0x27   : > { %s1930_s26 = smov (%p42_p12, %s40_s26), 0  ;;  %p1586_p7 = por %p1523_p2, %p56_p13 }
  0x28   : > { %1902 = sst [smem:[#allocation21_spill]] %s1930_s26  ;;  %p1580_p5 = por %p57_p0, %p56_p13 }
  0x29   : > { %s44_s16 = ssub.s32 %s1422_s9, %s1930_s26  ;;  %s323_s23 = sand.u32 1, %s1414_s29  }
  0x2a   : > { %p47_p9 = scmp.eq.s32.totalorder %s44_s16, 0  ;;  %s939_s11 = sshll.u32 %s323_s23, 6 }
  0x2b   : > { %s972_s12 = sshll.u32 %s1422_s9, 6  ;;  %s327_s17 = scalar_lea.vmem [#allocation2], %s939_s11 }
  0x2c   : > { %s1595_s24 = scalar_select %p47_p9, %s1414_s29, %s49_s18  }
  0x2d   : > { %s334_s22 = scalar_lea.hbm %s1874_s0, %s972_s12  ;;  %s337_s4 = sshll.u32 %s327_s17, 4  ;;  %s338_s4 = int_to_ptr.vmem [resolvable:$true] %s337_s4 }
  0x2e   : > { %s335_s3 = sshll.u32 %s334_s22, 4  ;;  %p1024_p10 = pnand %p1035_p3, %p1580_p5  ;;  %s336_s3 = int_to_ptr.hbm [resolvable:$true] %s335_s3 }
  0x2f   : > { %s324_s6 = scalar_lea.sflag [#allocation3], %s323_s23  ;;  %s1434_s26 = smov 256  }
  0x30   : > { %s1435_s27 = smov 16   ;;  %349 = sbr.rel (%p1542_p8) target bundleno = 309 (0x135), region = 48 }
  0x31   : > { %1026 = dma.hbm_to_vmem [thread:$0]  (!%p1024_p10), %s336_s3, 1024, %s338_s4, %s324_s6, %s1434_s26, %s1434_s26, %s1435_s27  }
  0x32   : > { %s1607_s18 = sand.u32 (!%p1542_p8), 1, %s1410_s28  }
  0x33   : > { %s943_s16 = sshll.u32 (!%p1542_p8), %s1607_s18, 6  ;;  %s352_s11 = scalar_lea.sflag (!%p1542_p8), [#allocation3], %s1607_s18 }
  0x34   : > { %s1613_s21 = scalar_lea.vmem (!%p1542_p8), [#allocation2], %s943_s16 }
  0x35   : > { %1385 = dma.done.wait (%p1529_p4), %s352_s11, 1024  }
  0x36   : > { %1387 = vsyncadd (%p1529_p4), %s352_s11, 4294966272 }
  0x37   : > { %1389 = dma.done.wait (%p1519_p1), [#allocation6], 1024  }
  0x38   : > { %1391 = vsyncadd (%p1519_p1), [#allocation6], 4294966272 }
  0x39   : > { %1393 = dma.done.wait (%p1519_p1), [#allocation9], 1024  }
  0x3a   : > { %1395 = vsyncadd (%p1519_p1), [#allocation9], 4294966272  ;;  %v1627_v0 = vld [vmem:[#allocation7] sm:$0xff]  ;;  %v1629_v1 = vld [vmem:[#allocation7 + $0x8] sm:$0xff]  ;;  %vm447_vm5 = vcmask 261120   ;;  %s1816_s4 = scalar_lea.vmem [#allocation11], %s943_s16 }
  0x3b   : > { %v1631_v2 = vld [vmem:[#allocation7 + $0x10] sm:$0xff]  ;;  %v1633_v3 = vld [vmem:[#allocation7 + $0x18] sm:$0xff]  ;;  %v538_v4 = vand.u32 2147483647, %v1627_v0  ;;  %v539_v5 = vand.u32 2147483647, %v1629_v1 }
  0x3c   : > { %v540_v6 = vand.u32 2147483647, %v1631_v2  ;;  %v541_v7 = vand.u32 2147483647, %v1633_v3  ;;  %v1639_v9 = vld [vmem:[#allocation10] sm:$0xff]  ;;  %v1641_v12 = vld [vmem:[#allocation10 + $0x8] sm:$0xff] }
  0x3d   : > { %v542_v8 = vsub.f32 0.0, %v538_v4  ;;  %v543_v10 = vsub.f32 0.0, %v539_v5  ;;  %v1643_v13 = vld [vmem:[#allocation10 + $0x10] sm:$0xff]  ;;  %v526_v14 = vld [vmem:[#allocation5] sm:$0xff]  ;;  %v1645_v17 = vld [vmem:[#allocation10 + $0x18] sm:$0xff]  ;;  %v534_v37 = vmax.f32 %v1627_v0, 0.0 }
  0x3e   : > { %v544_v11 = vsub.f32 0.0, %v540_v6  ;;  %v545_v15 = vsub.f32 0.0, %v541_v7  ;;  %v655_v20 = vand.u32 2147483647, %v1639_v9  ;;  %v656_v22 = vand.u32 2147483647, %v1641_v12 }
  0x3f   : > { %v546_v16 = vmul.f32 1.442695, %v542_v8  ;;  %v548_v18 = vmul.f32 1.442695, %v543_v10  ;;  %v657_v23 = vand.u32 2147483647, %v1643_v13  ;;  %v1651_v31 = vmul.f32 %v526_v14, %v526_v14 }
  0x40   : > { %v550_v19 = vmul.f32 1.442695, %v544_v11  ;;  %v552_v21 = vmul.f32 1.442695, %v545_v15  ;;  %v527_v24 = vld [vmem:[#allocation5 + $0x8] sm:$0xff]  ;;  %v659_v26 = vsub.f32 0.0, %v655_v20 }
  0x41   : > { %1106 = vpow2.f32 %v546_v16  ;;  %v658_v25 = vand.u32 2147483647, %v1645_v17  ;;  %v528_v27 = vld [vmem:[#allocation5 + $0x10] sm:$0xff]  ;;  %v660_v28 = vsub.f32 0.0, %v656_v22  ;;  %v661_v29 = vsub.f32 0.0, %v657_v23  ;;  %v529_v30 = vld [vmem:[#allocation5 + $0x18] sm:$0xff] }
  0x42   : > { %1108 = vpow2.f32 %v548_v18  ;;  %v663_v32 = vmul.f32 1.442695, %v659_v26  ;;  %v1653_v33 = vmul.f32 %v527_v24, %v527_v24  ;;  %v535_v38 = vmax.f32 %v1629_v1, 0.0  ;;  %s973_s16 = sshll.u32 %s1418_s30, 6  ;;  %s779_s15 = sshll.u32 %s1816_s4, 4  ;;  %s780_s15 = int_to_ptr.vmem [resolvable:$true] %s779_s15 }
  0x43   : > { %1110 = vpow2.f32 %v550_v19  ;;  %v662_v34 = vsub.f32 0.0, %v658_v25  ;;  %v665_v35 = vmul.f32 1.442695, %v660_v28  ;;  %v667_v36 = vmul.f32 1.442695, %v661_v29  ;;  %s778_s13 = scalar_lea.hbm %s1881_s7, %s973_s16  ;;  %s765_s30 = scalar_lea.sflag [#allocation4], %s1607_s18 }
  0x44   : > { %1112 = vpow2.f32 %v552_v21  ;;  %v1657_v39 = vmul.f32 %v528_v27, %v528_v27  ;;  %v536_v41 = vmax.f32 %v1631_v2, 0.0  ;;  %v537_v42 = vmax.f32 %v1633_v3, 0.0  ;;  %v422_v21 = vld [vmem:[%s1613_s21 + $0x38] sm:$0xff]  ;;  %v419_v27 = vld [vmem:[%s1613_s21 + $0x20] sm:$0xff]  ;;  %s781_s20 = sshll.u32 %s778_s13, 4  ;;  %s1324_s19 = scalar_lea.hbm %s1881_s7, 128  ;;  %s782_s20 = int_to_ptr.hbm [resolvable:$true] %s781_s20 }
  0x45   : > { %1114 = vpow2.f32 %v663_v32  ;;  %v1661_v43 = vmul.f32 %v529_v30, %v529_v30  ;;  %v651_v47 = vmax.f32 %v1639_v9, 0.0  ;;  %v652_v48 = vmax.f32 %v1641_v12, 0.0  ;;  %978 = vmatpush.msra.mxu3 %v422_v21  ;;  %501 = vmatpush.msra.mxu1 %v422_v21  ;;  %s1318_s26 = sshra.s32 %s782_s20, 4  ;;  %s1319_s26 = int_to_ptr.hbm [resolvable:$true] %s1318_s26 }
  0x46   : > { %1116 = vpow2.f32 %v665_v35  ;;  %v669_v52 = vmul.f32 1.442695, %v662_v34  ;;  %v653_v63 = vmax.f32 %v1643_v13, 0.0  ;;  %s1320_s23 = scalar_lea.hbm %s1319_s26, 64  ;;  %p1325_p12 = scmp.lt.s32.totalorder %s1319_s26, %s1881_s7 }
  0x47   : > { %v1107_v40 = vpop.eup %1106  ;;  %1118 = vpow2.f32 %v667_v36  ;;  %p1321_p1 = scmp.ne.s32.totalorder %s1319_s26, %s1320_s23  ;;  %p1326_p13 = scmp.lt.s32.totalorder %s1324_s19, %s1320_s23 }
  0x48   : > { %v1109_v44 = vpop.eup %1108  ;;  %v554_v45 = vadd.f32 1.0, %v1107_v40  ;;  %v557_v46 = vmul.f32 -0.5, %v1107_v40  ;;  %v560_v54 = vand.u32 2147483647, %v1107_v40 }
  0x49   : > { %v1111_v49 = vpop.eup %1110  ;;  %v563_v50 = vadd.f32 1.0, %v1109_v44  ;;  %v566_v51 = vmul.f32 -0.5, %v1109_v44  ;;  %v569_v55 = vand.u32 2147483647, %v1109_v44  ;;  %p1322_p4 = pnand %p1321_p1, %p1586_p7  ;;  %p1327_p0 = por %p1326_p13, %p1325_p12 }
  0x4a   : > { %v1113_v53 = vpop.eup %1112  ;;  %1120 = vlog2.f32 %v554_v45  ;;  %v572_v56 = vadd.f32 1.0, %v1111_v49  ;;  %v558_v57 = vadd.f32 1.0, %v557_v46  ;;  %v575_v59 = vmul.f32 -0.5, %v1111_v49 }
  0x4b   : > { %1122 = vlog2.f32 %v563_v50  ;;  %v567_v58 = vadd.f32 1.0, %v566_v51  ;;  %v1665_v60 = vpop.eup %1114  ;;  %v578_v61 = vand.u32 2147483647, %v1111_v49  ;;  %v581_v62 = vadd.f32 1.0, %v1113_v53  ;;  %p1323_p8 = pneg %p1322_p4 }
  0x4c   : > { %1124 = vlog2.f32 %v572_v56  ;;  %v1117_v4 = vpop.eup %1116  ;;  %v576_v5 = vadd.f32 1.0, %v575_v59  ;;  %v584_v6 = vmul.f32 -0.5, %v1113_v53  ;;  %v587_v7 = vand.u32 2147483647, %v1113_v53 }
  0x4d   : > { %1126 = vpow2.f32 %v669_v52  ;;  %vm1668_vm0 = vcmp.lt.f32.partialorder %v560_v54, 0.0004427343  ;;  %v671_v10 = vadd.f32 1.0, %v1665_v60  ;;  %v674_v11 = vmul.f32 -0.5, %v1665_v60  ;;  %v1674_v14 = vpop.eup %1118  ;;  %p1328_p3 = pnand %p1327_p0, %p1323_p8 }
  0x4e   : > { %1128 = vlog2.f32 %v581_v62  ;;  %v559_v15 = vmul.f32 %v1107_v40, %v558_v57  ;;  %v568_v16 = vmul.f32 %v1109_v44, %v567_v58  ;;  %vm1676_vm1 = vcmp.lt.f32.partialorder %v569_v55, 0.0004427343 }
  0x4f   : > { %v585_v19 = vadd.f32 1.0, %v584_v6  ;;  %vm1680_vm2 = vcmp.lt.f32.partialorder %v578_v61, 0.0004427343  ;;  %1130 = vlog2.f32 %v671_v10  ;;  %v680_v22 = vadd.f32 1.0, %v1117_v4 }
  0x50   : > { %v1121_v20 = vpop.eup %1120  ;;  %v683_v23 = vmul.f32 -0.5, %v1117_v4  ;;  %v577_v26 = vmul.f32 %v1111_v49, %v576_v5  ;;  %vm1684_vm3 = vcmp.lt.f32.partialorder %v587_v7, 0.0004427343  ;;  %v677_v28 = vand.u32 2147483647, %v1665_v60 }
  0x51   : > { %v1123_v24 = vpop.eup %1122  ;;  %v556_v25 = vmul.f32 0.6931472, %v1121_v20  ;;  %v586_v32 = vmul.f32 %v1113_v53, %v585_v19  ;;  %v675_v34 = vadd.f32 1.0, %v674_v11  ;;  %1132 = vlog2.f32 %v680_v22  ;;  %v421_v20 = vld [vmem:[%s1613_s21 + $0x30] sm:$0xff] }
  0x52   : > { %v1125_v29 = vpop.eup %1124  ;;  %v565_v30 = vmul.f32 0.6931472, %v1123_v24  ;;  %v686_v44 = vand.u32 2147483647, %v1117_v4  ;;  %v689_v45 = vadd.f32 1.0, %v1674_v14  ;;  %v684_v51 = vadd.f32 1.0, %v683_v23  ;;  %974 = vmatpush.msra.mxu2 %v421_v20  ;;  %472 = vmatpush.msra.mxu0 %v421_v20 }
  0x53   : > { %v1689_v35 = vpop.eup %1126  ;;  %v562_v36 = vsel %vm1668_vm0, %v559_v15, %v556_v25  ;;  %v574_v40 = vmul.f32 0.6931472, %v1125_v29  ;;  %v692_v52 = vmul.f32 -0.5, %v1674_v14  ;;  %vm1705_vm4 = vcmp.lt.f32.partialorder %v677_v28, 0.0004427343  ;;  %v420_v28 = vld [vmem:[%s1613_s21 + $0x28] sm:$0xff] }
  0x54   : > { %v1129_v46 = vpop.eup %1128  ;;  %v571_v49 = vsel %vm1676_vm1, %v568_v16, %v565_v30  ;;  %v590_v50 = vadd.f32 %v562_v36, %v534_v37  ;;  %1134 = vlog2.f32 %v689_v45  ;;  %v1717_v5 = vmul.f32 %v1665_v60, %v675_v34  ;;  %975 = vmatpush.msra.mxu2 %v419_v27  ;;  %979 = vmatpush.msra.mxu3 %v420_v28  ;;  %v417_v36 = vld [vmem:[%s1613_s21 + $0x10] sm:$0xff] }
  0x55   : > { %v580_v53 = vsel %vm1680_vm2, %v577_v26, %v574_v40  ;;  %v583_v54 = vmul.f32 0.6931472, %v1129_v46  ;;  %v591_v55 = vadd.f32 %v571_v49, %v535_v38  ;;  %v1131_v56 = vpop.eup %1130  ;;  %v693_v61 = vadd.f32 1.0, %v692_v52  ;;  %v416_v52 = vld [vmem:[%s1613_s21 + $0x8] sm:$0xff]  ;;  %473 = vmatpush.msra.mxu0 %v419_v27  ;;  %502 = vmatpush.msra.mxu1 %v420_v28 }
  0x56   : > { %v592_v57 = vadd.f32 %v580_v53, %v536_v41  ;;  %v594_v58 = vmul.f32 %v590_v50, %v590_v50  ;;  %1136 = vlog2.f32 %v590_v50  ;;  %v1714_v41 = vmul.f32 0.6931472, %v1131_v56  ;;  %v418_v50 = vld [vmem:[%s1613_s21 + $0x18] sm:$0xff]  ;;  %976 = vmatpush.msra.mxu2 %v417_v36 }
  0x57   : > { %v589_v37 = vsel %vm1684_vm3, %v586_v32, %v583_v54  ;;  %v595_v59 = vmul.f32 %v591_v55, %v591_v55  ;;  %1138 = vlog2.f32 %v591_v55  ;;  %v1133_v62 = vpop.eup %1132  ;;  %v1719_v6 = vmul.f32 %v1117_v4, %v684_v51  ;;  %v415_v51 = vld [vmem:[%s1613_s21] sm:$0xff]  ;;  %980 = vmatpush.msra.mxu3 %v418_v50  ;;  %474 = vmatpush.msra.mxu0 %v417_v36  ;;  %v424_v36 = vld [vmem:[%s1876_s2 + $0x8] sm:$0xff] }
  0x58   : > { %v593_v1 = vadd.f32 %v589_v37, %v537_v42  ;;  %v596_v38 = vmul.f32 %v592_v57, %v592_v57  ;;  %v602_v2 = vadd.f32 %v1651_v31, %v594_v58  ;;  %1140 = vlog2.f32 %v592_v57  ;;  %v643_v58 = vld [vmem:[#allocation8] sm:$0xff]  ;;  %977 = vmatpush.msra.mxu2 %v415_v51  ;;  %503 = vmatpush.msra.mxu1 %v418_v50 }
  0x59   : > { %vm1721_vm6 = vcmp.lt.f32.partialorder %v686_v44, 0.0004427343  ;;  %v603_v3 = vadd.f32 %v1653_v33, %v595_v59  ;;  %v1726_v42 = vmul.f32 0.6931472, %v1133_v62  ;;  %v1730_v60 = vmul.f32 %v1674_v14, %v693_v61  ;;  %981 = vmatpush.msra.mxu3 %v416_v52  ;;  %475 = vmatpush.msra.mxu0 %v415_v51 }
  0x5a   : > { %v597_v8 = vmul.f32 %v593_v1, %v593_v1  ;;  %1142 = vlog2.f32 %v593_v1  ;;  %v1135_v31 = vpop.eup %1134  ;;  %v604_v10 = vadd.f32 %v1657_v39, %v596_v38  ;;  %v695_v4 = vand.u32 2147483647, %v1674_v14  ;;  %504 = vmatpush.msra.mxu1 %v416_v52 }
  0x5b   : > { %v698_v11 = vadd.f32 1.0, %v1689_v35  ;;  %v957_v18 = vadd.f32 -1.0, %v602_v2  ;;  %v691_v19 = vmul.f32 0.6931472, %v1135_v31  ;;  %v701_v33 = vmul.f32 -0.5, %v1689_v35 }
  0x5c   : > { %v1137_v15 = vpop.eup %1136  ;;  %v605_v16 = vadd.f32 %v1661_v43, %v597_v8  ;;  %vm1738_vm7 = vcmp.lt.f32.partialorder %v695_v4, 0.0004427343  ;;  %v704_v14 = vand.u32 2147483647, %v1689_v35  ;;  %v958_v24 = vadd.f32 -1.0, %v603_v3  ;;  %v645_v8 = vld [vmem:[#allocation8 + $0x10] sm:$0xff] }
  0x5d   : > { %v1139_v22 = vpop.eup %1138  ;;  %v611_v39 = vmul.f32 0.6931472, %v1137_v15  ;;  %1144 = vlog2.f32 %v698_v11  ;;  %v702_v26 = vadd.f32 1.0, %v701_v33  ;;  %v959_v29 = vadd.f32 -1.0, %v604_v10  ;;  %v646_v3 = vld [vmem:[#allocation8 + $0x18] sm:$0xff]  ;;  %v423_v15 = vld [vmem:[%s1876_s2] sm:$0xff] }
  0x5e   : > { %v1141_v43 = vpop.eup %1140  ;;  %v613_v25 = vmul.f32 0.6931472, %v1139_v22  ;;  %v679_v34 = vsel %vm1705_vm4, %v1717_v5, %v1714_v41  ;;  %v960_v44 = vadd.f32 -1.0, %v605_v16  ;;  %v654_v46 = vmax.f32 %v1645_v17, 0.0  ;;  %v413_v17 = vld [vmem:[%s1875_s1 + $0x10] sm:$0xff]  ;;  %v644_v5 = vld [vmem:[#allocation8 + $0x8] sm:$0xff] }
  0x5f   : > { %v615_v30 = vmul.f32 0.6931472, %v1141_v43  ;;  %v618_v32 = vmul.f32 2.0, %v611_v39  ;;  %v688_v49 = vsel %vm1721_vm6, %v1719_v6, %v1726_v42  ;;  %v697_v56 = vsel %vm1738_vm7, %v1730_v60, %v691_v19  ;;  %951 = vmatmul.msk.f32.vlgmr.msra.gmra.mxu2 %vm447_vm5, %v413_v17  ;;  %955 = vmatmul.msk.f32.vlgmr.msra.gmra.mxu3 %vm447_vm5, %v413_v17  ;;  %v425_v16 = vld [vmem:[%s1876_s2 + $0x10] sm:$0xff]  ;;  %v414_v22 = vld [vmem:[%s1875_s1 + $0x18] sm:$0xff] }
  0x60   : > { %v1143_v40 = vpop.eup %1142  ;;  %v619_v45 = vmul.f32 2.0, %v613_v25  ;;  %v703_v0 = vmul.f32 %v1689_v35, %v702_v26  ;;  %vm1765_vm8 = vcmp.lt.f32.partialorder %v704_v14, 0.0004427343  ;;  %v707_v59 = vadd.f32 %v679_v34, %v651_v47  ;;  %v411_v35 = vld [vmem:[%s1875_s1] sm:$0xff]  ;;  %v412_v14 = vld [vmem:[%s1875_s1 + $0x8] sm:$0xff] }
  0x61   : > { %v617_v53 = vmul.f32 0.6931472, %v1143_v40  ;;  %v620_v54 = vmul.f32 2.0, %v615_v30  ;;  %v622_v55 = vsub.f32 %v957_v18, %v618_v32  ;;  %v708_v2 = vadd.f32 %v688_v49, %v652_v48  ;;  %949 = vmatmul.msk.f32.vlgmr.msra.gmra.mxu0 %vm447_vm5, %v411_v35  ;;  %953 = vmatmul.msk.f32.vlgmr.msra.gmra.mxu1 %vm447_vm5, %v411_v35  ;;  %v426_v40 = vld [vmem:[%s1876_s2 + $0x18] sm:$0xff] }
  0x62   : > { %v623_v57 = vsub.f32 %v958_v24, %v619_v45  ;;  %v709_v47 = vadd.f32 %v697_v56, %v653_v63  ;;  %v711_v6 = vmul.f32 %v707_v59, %v707_v59  ;;  %v715_v42 = vmul.f32 %v643_v58, %v643_v58 }
  0x63   : > { %v1145_v61 = vpop.eup %1144  ;;  %v621_v62 = vmul.f32 2.0, %v617_v53  ;;  %v624_v1 = vsub.f32 %v959_v29, %v620_v54  ;;  %v626_v38 = vsel %vm447_vm5, %v622_v55, 0.0  ;;  %v712_v10 = vmul.f32 %v708_v2, %v708_v2 }
  0x64   : > { %v627_v41 = vsel %vm447_vm5, %v623_v57, 0.0  ;;  %v700_v9 = vmul.f32 0.6931472, %v1145_v61  ;;  %v713_v13 = vmul.f32 %v709_v47, %v709_v47  ;;  %1146 = vlog2.f32 %v707_v59 }
  0x65   : > { %v625_v12 = vsub.f32 %v960_v44, %v621_v62  ;;  %v628_v48 = vadd.f32 %v627_v41, %v626_v38  ;;  %v629_v7 = vsel %vm447_vm5, %v624_v1, 0.0  ;;  %v716_v11 = vmul.f32 %v644_v5, %v644_v5 }
  0x66   : > { %v706_v31 = vsel %vm1765_vm8, %v703_v0, %v700_v9  ;;  %v717_v18 = vmul.f32 %v645_v8, %v645_v8  ;;  %v718_v19 = vmul.f32 %v646_v3, %v646_v3  ;;  %1148 = vlog2.f32 %v708_v2 }
  0x67   : > { %v630_v63 = vadd.f32 %v629_v7, %v628_v48  ;;  %v631_v60 = vsel %vm447_vm5, %v625_v12, 0.0  ;;  %v710_v4 = vadd.f32 %v706_v31, %v654_v46  ;;  %v719_v21 = vadd.f32 %v715_v42, %v711_v6  ;;  %952 = vmatmul.msk.f32.gmra.mxu2 %vm447_vm5, %v414_v22  ;;  %956 = vmatmul.msk.f32.gmra.mxu3 %vm447_vm5, %v414_v22 }
  0x68   : > { %1150 = vlog2.f32 %v709_v47  ;;  %v1436_v39 = vmov 0   ;;  %v720_v23 = vadd.f32 %v716_v11, %v712_v10  ;;  %v721_v24 = vadd.f32 %v717_v18, %v713_v13 }
  0x69   : > { %v632_v33 = vadd.f32 %v631_v60, %v630_v63  ;;  %v714_v20 = vmul.f32 %v710_v4, %v710_v4  ;;  %1103 = vset.pattern.permute.xlu1 %v1436_v39  ;;  %1104 = vset.pattern.permute.xlu2 %v1436_v39  ;;  %1152 = vlog2.f32 %v710_v4  ;;  %v961_v26 = vadd.f32 -1.0, %v719_v21 }
  0x6a   : > { %429 = vperm.xlu1 %1103, %v423_v15   ;;  %439 = vperm.xlu2 %1104, %v425_v16   ;;  %v1147_v43 = vpop.eup %1146  ;;  %v962_v30 = vadd.f32 -1.0, %v720_v23  ;;  %v963_v45 = vadd.f32 -1.0, %v721_v24 }
  0x6b   : > { %633 = vadd.xlane.f32.xlu0 %v632_v33  ;;  %v722_v25 = vadd.f32 %v718_v19, %v714_v20  ;;  %v728_v27 = vmul.f32 0.6931472, %v1147_v43  ;;  %950 = vmatmul.msk.f32.gmra.mxu0 %vm447_vm5, %v412_v14 }
  0x6c   : > { %1105 = vset.pattern.permute.xlu0 %v1436_v39  ;;  %v1149_v28 = vpop.eup %1148  ;;  %954 = vmatmul.msk.f32.gmra.mxu1 %vm447_vm5, %v412_v14 }
  0x6d   : > { %v730_v32 = vmul.f32 0.6931472, %v1149_v28  ;;  %v735_v34 = vmul.f32 2.0, %v728_v27  ;;  %v964_v49 = vadd.f32 -1.0, %v722_v25 }
  0x6e   : > { %v1151_v29 = vpop.eup %1150 }
  0x6f   : > { %v1153_v44 = vpop.eup %1152  ;;  %v732_v46 = vmul.f32 0.6931472, %v1151_v29  ;;  %v736_v51 = vmul.f32 2.0, %v730_v32  ;;  %v739_v52 = vsub.f32 %v961_v26, %v735_v34 }
  0x70   : > { %v734_v50 = vmul.f32 0.6931472, %v1153_v44 }
  0x71   : > { %v737_v53 = vmul.f32 2.0, %v732_v46  ;;  %v740_v55 = vsub.f32 %v962_v30, %v736_v51  ;;  %v743_v56 = vsel %vm447_vm5, %v739_v52, 0.0 }
  0x72   : > { %434 = vperm.xlu1 %1103, %v424_v36   ;;  %444 = vperm.xlu2 %1104, %v426_v40   ;;  %v738_v54 = vmul.f32 2.0, %v734_v50 }
  0x73   : > { %v741_v17 = vsub.f32 %v963_v45, %v737_v53  ;;  %v744_v58 = vsel %vm447_vm5, %v740_v55, 0.0 }
  0x74   : > { %v742_v57 = vsub.f32 %v964_v49, %v738_v54  ;;  %v745_v0 = vadd.f32 %v744_v58, %v743_v56 }
  0x75   : > { %v746_v37 = vsel %vm447_vm5, %v741_v17, 0.0 }
  0x76   : > { %v748_v59 = vsel %vm447_vm5, %v742_v57, 0.0  ;;  %v747_v61 = vadd.f32 %v746_v37, %v745_v0 }
  0x78   : > { %v749_v62 = vadd.f32 %v748_v59, %v747_v61 }
  0x7a   : > { %750 = vadd.xlane.f32.xlu0 %v749_v62 }
  0xc4   : > { %v440_v12 = vpop.permute.xlu2 %439 }
  0xcc   : > { %v445_v18 = vpop.permute.xlu2 %444 }
  0xdc   : > { %v430_v41 = vpop.permute.xlu1 %429 }
  0xde   : > { %v634_v1 = vpop.xlane.xlu0 %633  ;;  %v477_v5 = vpop.f32.mrf.mxu0 }
  0xdf   : > { %v635_v38 = vrot.slane %v634_v1, 4  ;;  %v478_v9 = vadd.f32 %v477_v5, %v430_v41  ;;  %v506_v6 = vpop.f32.mrf.mxu1 }
  0xe0   : > { %v507_v48 = vadd.f32 %v506_v6, %v430_v41 }
  0xe1   : > { %v636_v2 = vadd.f32 %v635_v38, %v634_v1  ;;  %518 = vst [vmem:[%s1816_s4] sm:$0xff] %v478_v9 }
  0xe2   : > { %v483_v8 = vpop.f32.mrf.mxu2  ;;  %v512_v3 = vpop.f32.mrf.mxu3  ;;  %519 = vst [vmem:[%s1816_s4 + $0x8] sm:$0xff] %v507_v48 }
  0xe3   : > { %v637_v35 = vrot.slane %v636_v2, 2  ;;  %v484_v42 = vadd.f32 %v483_v8, %v440_v12  ;;  %v513_v31 = vadd.f32 %v512_v3, %v440_v12 }
  0xe4   : > { %v435_v19 = vpop.permute.xlu1 %434 }
  0xe5   : > { %v638_v47 = vadd.f32 %v637_v35, %v636_v2  ;;  %522 = vst [vmem:[%s1816_s4 + $0x20] sm:$0xff] %v484_v42 }
  0xe6   : > { %523 = vst [vmem:[%s1816_s4 + $0x28] sm:$0xff] %v513_v31 }
  0xe7   : > { %v639_v7 = vrot.slane %v638_v47, 1 }
  0xe8   : > { %v480_v33 = vpop.f32.mrf.mxu0 }
  0xe9   : > { %v640_v10 = vadd.f32 %v639_v7, %v638_v47  ;;  %v481_v21 = vadd.f32 %v480_v33, %v435_v19  ;;  %v509_v39 = vpop.f32.mrf.mxu1 }
  0xea   : > { %v486_v20 = vpop.f32.mrf.mxu2  ;;  %v515_v23 = vpop.f32.mrf.mxu3  ;;  %v510_v14 = vadd.f32 %v509_v39, %v435_v19 }
  0xeb   : > { %982 = vpush %v640_v10  ;;  %v487_v22 = vadd.f32 %v486_v20, %v445_v18  ;;  %v516_v43 = vadd.f32 %v515_v23, %v445_v18 }
  0xec   : > { %520 = vst [vmem:[%s1816_s4 + $0x10] sm:$0xff] %v481_v21 }
  0xed   : > { %v751_v13 = vpop.xlane.xlu0 %750  ;;  %524 = vst [vmem:[%s1816_s4 + $0x30] sm:$0xff] %v487_v22 }
  0xee   : > { %v752_v63 = vrot.slane %v751_v13, 4  ;;  %521 = vst [vmem:[%s1816_s4 + $0x18] sm:$0xff] %v510_v14 }
  0xef   : > { %525 = vst [vmem:[%s1816_s4 + $0x38] sm:$0xff] %v516_v43 }
  0xf0   : > { %v753_v60 = vadd.f32 %v752_v63, %v751_v13 }
  0xf2   : > { %v754_v4 = vrot.slane %v753_v60, 2 }
  0xf4   : > { %v755_v11 = vadd.f32 %v754_v4, %v753_v60 }
  0xf6   : > { %v756_v15 = vrot.slane %v755_v11, 1 }
  0xf8   : > { %v757_v16 = vadd.f32 %v756_v15, %v755_v11 }
  0xfa   : > { %984 = vpush %v757_v16 }
  0xfb   : > { %1331 = shalt.err (!%p1328_p3)
}
  0xfc   : > { %s1437_s18 = smov 256   ;;  %s1438_s17 = smov 16   ;;  %vm762_vm9 = vcmask 0  }
  0xfd   : > { %1004 = dma.vmem_to_hbm [thread:$0]  (%p1586_p7), %s780_s15, 1024, %s782_s20, %s765_s30, %s1437_s18, %s1437_s18, %s1438_s17  }
  0xfe   : > { %s1439_s21 = smov [#allocation12]   ;;  %s796_s26 = sshll.u32 %s1882_s8, 4  ;;  %s797_s26 = int_to_ptr.hbm [resolvable:$true] %s796_s26 }
  0xff   : > { %s794_s4 = sshll.u32 %s1439_s21, 4  ;;  %s795_s4 = int_to_ptr.vmem [resolvable:$true] %s794_s4 }
 0x11c   : > { %s983_s11 = spop %982 }
 0x11d   : > { %s642_s16 = smul.f32 0.5, %s983_s11 }
 0x12b   : > { %s985_s6 = spop %984 }
 0x12c   : > { %s759_s27 = smul.f32 0.5, %s985_s6 }
 0x12e   : > { %s760_s23 = sadd.f32 %s759_s27, %s642_s16 }
 0x130   : > { %v761_v24 = vstv %s760_s23 }
 0x131   : > { %763 = vst.msk [vmem:[#allocation12] sm:$0x1] %vm762_vm9, %v761_v24 }
 0x132   : > { %1006 = dma.vmem_to_hbm [thread:$0]  (%p1523_p2), %s795_s4, 16, %s797_s26, [#allocation13]  }
 0x133   : > { %1397 = dma.done.wait (%p1523_p2), [#allocation13], 16  }
 0x134   : > { %1399 = vsyncadd (%p1523_p2), [#allocation13], 4294967280 }
 0x135 PF: > { %s1921_s5 = sld [smem:[#allocation19_spill]]  ;;  %p1028_p5 = pnand %p938_p11, %p1534_p6 }
 0x137   : > { %p1029_p7 = pneg %p1028_p5 }
 0x13b   : > { %s813_s20 = sand.u32 1, %s1921_s5  }
 0x13c   : > { %s814_s30 = scalar_lea.sflag [#allocation4], %s813_s20 }
 0x13d   : > { %1401 = dma.done.wait (%p1029_p7), %s814_s30, 1024  }
 0x13e   : > { %1403 = vsyncadd (%p1029_p7), %s814_s30, 4294966272  ;;  %s28_s10 = sadd.s32 1, %s1426_s10   ;;  %s1923_s14 = sld [smem:[#allocation21_spill]] }
 0x13f   : > { %p25_p9 = scmp.ge.s32.totalorder %s28_s10, 4   ;;  %s1924_s27 = smov %s1410_s28 }
 0x140   : > { %s1925_s28 = smov %s1414_s29  ;;  %s1926_s29 = smov %s1595_s24 }
 0x141   : > { %s1927_s30 = smov %s1422_s9  ;;  %27 = sbr.rel (!%p25_p9) target bundleno = 14 (0xe), region = 117 }
 0x144   : > { %s1928_s9 = smov %s1923_s14 }
 0x146   :  { %820 = vsyncpa [#allocation3], 1 }
 0x147   :  { %822 = vsyncpa [#allocation3 + $0x1], 1 }
 0x148   :  { %823 = vsyncpa [#allocation6], 1 }
 0x149   :  { %824 = vsyncpa [#allocation9], 1 }
 0x14a   :  { %825 = vsyncpa [#allocation4], 1 }
 0x14b   :  { %827 = vsyncpa [#allocation4 + $0x1], 1 }
 0x14c   :  { %828 = vsyncpa [#allocation13], 1 }

</bundles_post_ra>
